<compile_context>
chip_gen: v7x
topology: tpu7x:2x2x1
jax: 0.10.0
libtpu: 0.0.40
codegen_flags: <defaults>
</compile_context>

<pallas_src>
import math

import jax
import jax.numpy as jnp
from jax.experimental import pallas as pl
from jax.experimental.pallas import tpu as pltpu


def linear_kernel(x_ref, w_ref, b_ref, o_ref):
    """One batch tile of y = x @ w + b, computed on the VPU.

    x_ref: (D, TN) VMEM  -- features along sublanes, batch along lanes
    w_ref: (D,)    SMEM  -- per-feature weight scalars
    b_ref: (1,)    SMEM  -- bias scalar
    o_ref: (1, TN) VMEM  -- lane-dense output row
    """
    d_dim = x_ref.shape[0]                      # static (trace-time) feature count
    acc = x_ref[0:1, :] * w_ref[0]              # (1, TN) VPU vector * scalar
    for d in range(1, d_dim):                   # D is tiny & static -> unrolled FMAs
        acc = acc + x_ref[d:d + 1, :] * w_ref[d]
    o_ref[...] = (acc + b_ref[0]).astype(o_ref.dtype)


def linear_forward(x, w, b, *, tn=2048):
    """Forward of nn.Linear(D, 1).

    x: (N, D) f32, w: (D,) f32, b: (1,) f32  ->  (N, 1) f32
    """
    N, D = x.shape
    x_t = x.T                                   # (D, N): batch -> lane axis (layout plumbing)

    if N <= tn:
        tile, grid_n, n_pad = N, 1, N           # single full-extent block (any N allowed)
    else:
        tile = tn                               # multiple of 128 -> lane-aligned tiles
        grid_n = pl.cdiv(N, tile)
        n_pad = grid_n * tile
        if n_pad != N:
            x_t = jnp.pad(x_t, ((0, 0), (0, n_pad - N)))

    out = pl.pallas_call(
        linear_kernel,
        out_shape=jax.ShapeDtypeStruct((1, n_pad), x.dtype),
        grid=(grid_n,),
        in_specs=[
            pl.BlockSpec((D, tile), lambda i: (0, i)),            # x_t tile (VMEM)
            pl.BlockSpec(memory_space=pltpu.MemorySpace.SMEM),    # w scalars (whole array)
            pl.BlockSpec(memory_space=pltpu.MemorySpace.SMEM),    # bias scalar
        ],
        out_specs=pl.BlockSpec((1, tile), lambda i: (0, i)),
        compiler_params=pltpu.CompilerParams(
            dimension_semantics=("parallel",),                    # batch axis shards across TCs
        ),
    )(x_t, w, b)

    return out[0, :N].reshape(N, 1)


if __name__ == "__main__":
    # Multi-variable linear regression: input_size = 2 features, batch = 8.
    N, D = 8, 2
    key = jax.random.PRNGKey(0)
    kx, kw, kb = jax.random.split(key, 3)

    x = jax.random.normal(kx, (N, D), dtype=jnp.float32)
    # Mimic nn.Linear's uniform(-1/sqrt(D), 1/sqrt(D)) init.
    bound = 1.0 / math.sqrt(D)
    w = jax.random.uniform(kw, (D,), minval=-bound, maxval=bound, dtype=jnp.float32)
    b = jax.random.uniform(kb, (1,), minval=-bound, maxval=bound, dtype=jnp.float32)

    out = linear_forward(x, w, b)
    jax.block_until_ready(out)

    ref = x @ w.reshape(D, 1) + b.reshape(1, 1)
    assert out.shape == (N, 1)
    assert jnp.allclose(out, ref, atol=1e-5, rtol=1e-5)

    # Also exercise the tiled / padded / parallel-grid path at a larger batch.
    N2 = 4500
    x2 = jax.random.normal(jax.random.PRNGKey(1), (N2, D), dtype=jnp.float32)
    out2 = linear_forward(x2, w, b)
    jax.block_until_ready(out2)
    ref2 = x2 @ w.reshape(D, 1) + b.reshape(1, 1)
    assert out2.shape == (N2, 1)
    assert jnp.allclose(out2, ref2, atol=1e-4, rtol=1e-5)

    print("KERNEL_OK")
</pallas_src>

<mosaic_0001>
module attributes {stable_mosaic.version = 11 : i64} {
  func.func @linear_kernel(%arg0: i32, %arg1: memref<2x8xf32, #tpu.memory_space<vmem>>, %arg2: memref<2xf32, #tpu.memory_space<smem>>, %arg3: memref<1xf32, #tpu.memory_space<smem>>, %arg4: memref<1x8xf32, #tpu.memory_space<vmem>>) attributes {dimension_semantics = [#tpu.dimension_semantics<parallel>], iteration_bounds = array<i64: 1>, scalar_prefetch = 0 : i64, scratch_operands = 0 : i64, tpu.core_type = #tpu.core_type<tc>, window_params = [{transform_indices = @transform_0, window_bounds = array<i64: 2, 8>}, {transform_indices = @transform_1, window_bounds = array<i64: 2>}, {transform_indices = @transform_2, window_bounds = array<i64: 1>}, {transform_indices = @transform_3, window_bounds = array<i64: 1, 8>}]} {
    %c0 = arith.constant 0 : index
    %c0_0 = arith.constant 0 : index
    %0 = vector.load %arg1[%c0, %c0_0] : memref<2x8xf32, #tpu.memory_space<vmem>>, vector<1x8xf32>
    %c0_1 = arith.constant 0 : index
    %1 = memref.load %arg2[%c0_1] : memref<2xf32, #tpu.memory_space<smem>>
    %2 = vector.broadcast %1 : f32 to vector<1x8xf32>
    %3 = arith.mulf %0, %2 : vector<1x8xf32>
    %c1 = arith.constant 1 : index
    %c0_2 = arith.constant 0 : index
    %4 = vector.load %arg1[%c1, %c0_2] : memref<2x8xf32, #tpu.memory_space<vmem>>, vector<1x8xf32>
    %c1_3 = arith.constant 1 : index
    %5 = memref.load %arg2[%c1_3] : memref<2xf32, #tpu.memory_space<smem>>
    %6 = vector.broadcast %5 : f32 to vector<1x8xf32>
    %7 = arith.mulf %4, %6 : vector<1x8xf32>
    %8 = arith.addf %3, %7 : vector<1x8xf32>
    %c0_4 = arith.constant 0 : index
    %9 = memref.load %arg3[%c0_4] : memref<1xf32, #tpu.memory_space<smem>>
    %10 = vector.broadcast %9 : f32 to vector<1x8xf32>
    %11 = arith.addf %8, %10 : vector<1x8xf32>
    %c0_5 = arith.constant 0 : index
    %c0_6 = arith.constant 0 : index
    %12 = vector.load %arg4[%c0_5, %c0_6] : memref<1x8xf32, #tpu.memory_space<vmem>>, vector<1x8xf32>
    tpu.vector_store %arg4[%c0_5, %c0_6], %11 {strides = array<i32>} : memref<1x8xf32, #tpu.memory_space<vmem>>, vector<1x8xf32>,
    return
  }
  func.func @transform_0(%arg0: i32) -> (i32, i32) {
    %c0_i32 = arith.constant 0 : i32
    %c0_i32_0 = arith.constant 0 : i32
    return %c0_i32, %arg0 : i32, i32
  }
  func.func @transform_1(%arg0: i32) -> i32 {
    %c0_i32 = arith.constant 0 : i32
    %c0_i32_0 = arith.constant 0 : i32
    return %c0_i32 : i32
  }
  func.func @transform_2(%arg0: i32) -> i32 {
    %c0_i32 = arith.constant 0 : i32
    %c0_i32_0 = arith.constant 0 : i32
    return %c0_i32 : i32
  }
  func.func @transform_3(%arg0: i32) -> (i32, i32) {
    %c0_i32 = arith.constant 0 : i32
    %c0_i32_0 = arith.constant 0 : i32
    return %c0_i32, %arg0 : i32, i32
  }
}

</mosaic_0001>

<bundles_post_ra>
// kernel: tpu_custom_call.1
= control target key start
LH: loop header
LB: loop body
LE: loop exit
PB: predicated region body
PF: predicated region fallthrough
CT: control target
= control target key end

     0   :  { %9 = vsyncpa [#allocation5], 0  ;;  %s145_s0 = inlined_call_operand.vmem [shape: f32[2,8], index: 0, kind: input, shape index: {}]   ;;  %s146_s1 = inlined_call_operand.vmem [shape: f32[2], index: 1, kind: input, shape index: {}]   ;;  %s147_s2 = inlined_call_operand.<no memory space> [shape: f32[1], index: 2, kind: input, shape index: {}]   ;;  %s148_s3 = inlined_call_operand.hbm [shape: f32[1,8], index: 3, kind: output, shape index: {}]  }
   0x1   :  { %10 = vsyncpa [#allocation4], 0  ;;  %s19_s14 = sshll.u32 %s146_s1, 4  ;;  %s20_s14 = int_to_ptr.vmem [resolvable:$true] %s19_s14 }
   0x2   :  { %s61_s15 = scalar_lea.vmem %s20_s14, 16  ;;  %p66_p1 = scmp.lt.s32.totalorder %s20_s14, %s20_s14 }
   0x3   :  { %p62_p0 = scmp.ne.s32.totalorder %s20_s14, %s61_s15  ;;  %p67_p2 = scmp.lt.s32.totalorder %s61_s15, %s61_s15 }
   0x5   :  { %p68_p3 = por %p67_p2, %p66_p1 }
   0x7   :  { %p69_p4 = pnand %p68_p3, %p62_p0 }
   0x9   :  { %72 = shalt.err (!%p69_p4)
}
   0xa   :  { %s99_s16 = smov [#allocation3]  }
   0xb   :  { %22 = dma.vmem_to_smem %s20_s14, 16, %s99_s16, [#allocation5]  }
   0xc   :  { %95 = dma.done.wait [#allocation5], 16  }
   0xd   :  { %96 = vsyncadd [#allocation5], 4294967280 }
   0xe   :  { %28 = sfence }
   0xf   :  { %s30_s17 = sld [smem:[#allocation3]]  ;;  %s58_s18 = sld [smem:[#allocation3 + $0x1]]  ;;  %v29_v0 = vld [vmem:[%s145_s0] sm:$0x1]  ;;  %v33_v1 = vld [vmem:[%s145_s0 + $0x1] sm:$0x1]  ;;  %v39_v6 = vstv %s147_s2 }
  0x10   :  { %s100_s24 = smov [#allocation6]   ;;  %vm41_vm0 = vcmask 57344  }
  0x11   :  { %s49_s25 = sshll.u32 %s100_s24, 4  ;;  %s50_s25 = int_to_ptr.vmem [resolvable:$true] %s49_s25 }
  0x12   :  { %s73_s26 = scalar_lea.vmem %s50_s25, 16  ;;  %s77_s27 = scalar_lea.vmem %s50_s25, 32 }
  0x13   :  { %p74_p5 = scmp.ne.s32.totalorder %s50_s25, %s73_s26  ;;  %p78_p6 = scmp.lt.s32.totalorder %s50_s25, %s50_s25 }
  0x14   :  { %p79_p7 = scmp.lt.s32.totalorder %s77_s27, %s73_s26 }
  0x15   :  { %v31_v2 = vstv %s30_s17  ;;  %v35_v4 = vstv %s58_s18 }
  0x16   :  { %v32_v3 = vmul.f32 %v31_v2, %v29_v0  ;;  %v36_v5 = vmul.f32 %v35_v4, %v33_v1  ;;  %p80_p8 = por %p79_p7, %p78_p6 }
  0x18   :  { %v37_v7 = vadd.f32 %v36_v5, %v32_v3  ;;  %p81_p9 = pnand %p80_p8, %p74_p5 }
  0x1a   :  { %v40_v8 = vadd.f32 %v39_v6, %v37_v7 }
  0x1c   :  { %42 = vst.msk [vmem:[#allocation6] sm:$0x1] %vm41_vm0, %v40_v8 }
  0x1d   :  { %84 = shalt.err (!%p81_p9)
}
  0x1e   :  { %s85_s29 = scalar_lea.hbm %s148_s3, 16 }
  0x1f   :  { %p86_p10 = scmp.ne.s32.totalorder %s148_s3, %s85_s29  ;;  %p89_p11 = scmp.lt.u32.totalorder %s85_s29, %s148_s3 }
  0x21   :  { %p91_p12 = pnand %p89_p11, %p86_p10 }
  0x23   :  { %94 = shalt.err (!%p91_p12)
}
  0x24   :  { %52 = dma.vmem_to_hbm [thread:$0]  %s50_s25, 16, %s148_s3, [#allocation4]  }
  0x25   :  { %97 = dma.done.wait [#allocation4], 16  }
  0x26   :  { %98 = vsyncadd [#allocation4], 4294967280 }
  0x27   :  { %56 = vsyncpa [#allocation4], 1 }
  0x28   :  { %57 = vsyncpa [#allocation5], 1 }

</bundles_post_ra>
